<compile_context>
chip_gen: v6e
topology: v6e:2x2x1
jax: 0.10.0
libtpu: 0.0.40
codegen_flags: <defaults>
</compile_context>

<pallas_src>
import jax
import jax.numpy as jnp
from jax import lax
from jax.experimental import pallas as pl
from jax.experimental.pallas import tpu as pltpu


def _round_up(a, b):
    return ((a + b - 1) // b) * b


def _dag_encoder_kernel(xh_ref, seg_ref, w1_ref, b1_ref, w2_ref, b2_ref, out_ref):
    # out_ref is a resident [num_dags_p, H2_pad] f32 accumulator across the
    # node-tile grid axis (the only grid axis).
    @pl.when(pl.program_id(0) == 0)
    def _():
        out_ref[...] = jnp.zeros_like(out_ref)

    cdt = xh_ref.dtype  # bf16 matmul operands; f32 accumulation + VPU elementwise

    # --- MLP hidden layers on this node tile (concat folded into stacked W1)
    z = jnp.dot(xh_ref[...], w1_ref[...],
                preferred_element_type=jnp.float32) + b1_ref[...]
    z = jnp.maximum(z, 0.0)                                  # f32 VPU (v5e-safe)
    z = jnp.dot(z.astype(cdt), w2_ref[...],
                preferred_element_type=jnp.float32) + b2_ref[...]
    z = jnp.maximum(z, 0.0)                                  # (tile, H2_pad), padded cols stay 0

    # --- segment_csr (reduce='sum') via one-hot matmul, bf16 operands / f32 acc.
    # seg_ref is (1, tile) lane-major so the compare against the iota needs no
    # cross-lane relayout; padded nodes carry seg_id = -1 and match no DAG row.
    num_dags_p, tile = out_ref.shape[0], z.shape[0]
    dag_iota = lax.broadcasted_iota(jnp.int32, (num_dags_p, tile), 0)
    onehot = (seg_ref[...] == dag_iota).astype(cdt)          # (num_dags_p, tile)
    out_ref[...] += jnp.dot(onehot, z.astype(cdt),
                            preferred_element_type=jnp.float32)


def dag_encoder(x, h_node, ptr, params, *, tile_cap=2048,
                compute_dtype=jnp.bfloat16):
    """x: [N, F] node features, h_node: [N, E] node embeddings,
    ptr: [num_dags+1] CSR offsets.  Returns [num_dags, E] float32."""
    N, F = x.shape
    E = h_node.shape[1]
    num_dags = int(ptr.shape[0]) - 1

    w1x, w1h, b1, w2, b2, w3, b3 = params
    H1, H2 = w1x.shape[1], w2.shape[1]

    # --- lane-dense resident accumulator geometry (unmasked stores)
    H2_pad = _round_up(H2, 128)
    num_dags_p = _round_up(num_dags, 8)
    w2p = jnp.pad(w2, ((0, 0), (0, H2_pad - H2)))      # zero cols -> zero hidden cols
    b2p = jnp.pad(b2, ((0, 0), (0, H2_pad - H2)))

    # --- node-tile geometry: single grid step when the batch fits under the
    # cap; otherwise capped tiles with a pipelining axis.  Rows are rounded to
    # 16 for bf16 sublane packing.
    row_align = 16 if compute_dtype == jnp.bfloat16 else 8
    if N <= tile_cap:
        tile = _round_up(max(N, row_align), row_align)
        T = 1
    else:
        tile = _round_up(tile_cap, 128)
        T = -(-N // tile)
    Np = T * tile

    # --- glue: CSR ptr -> per-node segment id; padded nodes get seg_id = -1
    seg_ids = (jnp.searchsorted(ptr, jnp.arange(N), side="right") - 1).astype(jnp.int32)

    # Pre-concatenate x || h_node (cheap layout plumbing) and cast to bf16.
    xh = jnp.concatenate([x, h_node], axis=1).astype(compute_dtype)   # [N, F+E]
    pad = Np - N
    if pad:
        xh = jnp.pad(xh, ((0, pad), (0, 0)))
        seg_ids = jnp.pad(seg_ids, (0, pad), constant_values=-1)
    seg_ids = seg_ids[None, :]                                        # (1, Np) lane-major

    # Stacked first-layer weights (cat([x,h]) @ W1 == x@W1x + h@W1h).
    w1 = jnp.concatenate([w1x, w1h], axis=0).astype(compute_dtype)    # [F+E, H1]
    w2c = w2p.astype(compute_dtype)
    b1f = b1.astype(jnp.float32)
    b2f = b2p.astype(jnp.float32)

    def w_spec(shp):
        return pl.BlockSpec(shp, lambda t, _s=shp: (0,) * len(_s))

    seg_sum = pl.pallas_call(
        _dag_encoder_kernel,
        out_shape=jax.ShapeDtypeStruct((num_dags_p, H2_pad), jnp.float32),
        grid=(T,),
        in_specs=[
            pl.BlockSpec((tile, F + E), lambda t: (t, 0)),    # x || h_node tile
            pl.BlockSpec((1, tile), lambda t: (0, t)),        # seg ids (lane-major)
            w_spec((F + E, H1)), w_spec((1, H1)),
            w_spec((H1, H2_pad)), w_spec((1, H2_pad)),
        ],
        out_specs=pl.BlockSpec((num_dags_p, H2_pad), lambda t: (0, 0)),
        compiler_params=pltpu.CompilerParams(
            dimension_semantics=("arbitrary",)),
    )(xh, seg_ids, w1, b1f, w2c, b2f)

    # Output layer folded past the linear segment reduction:
    #   segment_sum(relu(z2) @ W3 + b3) == segment_sum(relu(z2)) @ W3 + counts*b3
    counts = (ptr[1:] - ptr[:-1]).astype(jnp.float32)
    h_dag = (jnp.dot(seg_sum[:num_dags, :H2], w3.astype(jnp.float32),
                     preferred_element_type=jnp.float32)
             + counts[:, None] * b3.astype(jnp.float32))
    return h_dag


def _reference(x, h_node, ptr, params, compute_dtype=jnp.bfloat16):
    """Pure-JAX reference in the original module's op order, mirroring the
    kernel's matmul-operand dtype (bf16 operands, f32 accumulation)."""
    cdt = compute_dtype
    f32 = jnp.float32
    w1x, w1h, b1, w2, b2, w3, b3 = params
    z = (jnp.dot(x.astype(cdt), w1x.astype(cdt), preferred_element_type=f32)
         + jnp.dot(h_node.astype(cdt), w1h.astype(cdt), preferred_element_type=f32)
         + b1)
    z = jnp.maximum(z, 0.0)
    z = jnp.dot(z.astype(cdt), w2.astype(cdt), preferred_element_type=f32) + b2
    z = jnp.maximum(z, 0.0)
    emb = jnp.dot(z.astype(cdt), w3.astype(f32), preferred_element_type=f32) + b3
    seg_ids = jnp.searchsorted(ptr, jnp.arange(x.shape[0]), side="right") - 1
    return jax.ops.segment_sum(emb, seg_ids, num_segments=int(ptr.shape[0]) - 1)


if __name__ == "__main__":
    # Shapes consistent with the module: num_node_features F=6, embed_dim E=16,
    # MLP hidden dims [32, 16].
    F, E, H1, H2 = 6, 16, 32, 16

    key = jax.random.PRNGKey(0)
    ks = jax.random.split(key, 11)

    def init_w(k, shape):
        return jax.random.normal(k, shape, jnp.float32) * 0.1

    params = (
        init_w(ks[2], (F, H1)),    # W1 rows for dag_batch.x
        init_w(ks[3], (E, H1)),    # W1 rows for h_node
        init_w(ks[4], (1, H1)),    # b1
        init_w(ks[5], (H1, H2)),   # W2
        init_w(ks[6], (1, H2)),    # b2
        init_w(ks[7], (H2, E)),    # W3 (output_dim = embed_dim)
        init_w(ks[8], (1, E)),     # b3
    )

    # --- case 1: small graph batch -> single grid step (tile = 32)
    N1 = 26
    ptr1 = jnp.array([0, 9, 15, 26], dtype=jnp.int32)
    x1 = jax.random.normal(ks[0], (N1, F), jnp.float32)
    h1 = jax.random.normal(ks[1], (N1, E), jnp.float32)

    out1 = jax.block_until_ready(dag_encoder(x1, h1, ptr1, params))
    ref1 = _reference(x1, h1, ptr1, params)
    assert out1.shape == (3, E)
    assert jnp.allclose(out1, ref1, atol=2e-3, rtol=2e-3), "case1 mismatch vs reference"

    # --- case 2: larger batch -> still a single grid step (tile = 608, no node padding waste)
    N2 = 600
    ptr2 = jnp.array([0, 60, 150, 230, 310, 420, 500, 600], dtype=jnp.int32)
    x2 = jax.random.normal(ks[9], (N2, F), jnp.float32)
    h2 = jax.random.normal(ks[10], (N2, E), jnp.float32)

    out2 = jax.block_until_ready(dag_encoder(x2, h2, ptr2, params))
    ref2 = _reference(x2, h2, ptr2, params)
    assert out2.shape == (7, E)
    assert jnp.allclose(out2, ref2, atol=2e-3, rtol=2e-3), "case2 mismatch vs reference"

    # --- case 3: exercise the multi-tile path (tile_cap below N -> T > 1,
    # resident accumulator across grid steps)
    out3 = jax.block_until_ready(dag_encoder(x2, h2, ptr2, params, tile_cap=256))
    assert out3.shape == (7, E)
    assert jnp.allclose(out3, ref2, atol=2e-3, rtol=2e-3), "case3 mismatch vs reference"

    print("KERNEL_OK")
</pallas_src>

<mosaic_0001>
module attributes {stable_mosaic.version = 11 : i64} {
  func.func @_dag_encoder_kernel(%arg0: i32, %arg1: memref<32x22xbf16, #tpu.memory_space<vmem>>, %arg2: memref<1x32xi32, #tpu.memory_space<vmem>>, %arg3: memref<22x32xbf16, #tpu.memory_space<vmem>>, %arg4: memref<1x32xf32, #tpu.memory_space<vmem>>, %arg5: memref<32x128xbf16, #tpu.memory_space<vmem>>, %arg6: memref<1x128xf32, #tpu.memory_space<vmem>>, %arg7: memref<8x128xf32, #tpu.memory_space<vmem>>) attributes {dimension_semantics = [#tpu.dimension_semantics<arbitrary>], iteration_bounds = array<i64: 1>, scalar_prefetch = 0 : i64, scratch_operands = 0 : i64, tpu.core_type = #tpu.core_type<tc>, window_params = [{transform_indices = @transform_0, window_bounds = array<i64: 32, 22>}, {transform_indices = @transform_1, window_bounds = array<i64: 1, 32>}, {pipeline_mode = #tpu.pipeline_mode<synchronous>, transform_indices = @transform_2, window_bounds = array<i64: 22, 32>}, {pipeline_mode = #tpu.pipeline_mode<synchronous>, transform_indices = @transform_3, window_bounds = array<i64: 1, 32>}, {pipeline_mode = #tpu.pipeline_mode<synchronous>, transform_indices = @transform_4, window_bounds = array<i64: 32, 128>}, {pipeline_mode = #tpu.pipeline_mode<synchronous>, transform_indices = @transform_5, window_bounds = array<i64: 1, 128>}, {pipeline_mode = #tpu.pipeline_mode<synchronous>, transform_indices = @transform_6, window_bounds = array<i64: 8, 128>}]} {
    %c0_i32 = arith.constant 0 : i32
    %0 = arith.cmpi eq, %arg0, %c0_i32 : i32
    %1 = arith.extui %0 : i1 to i32
    %c0_i32_0 = arith.constant 0 : i32
    %2 = arith.cmpi ne, %1, %c0_i32_0 : i32
    scf.if %2 {
      %cst_20 = arith.constant 0.000000e+00 : f32
      %31 = vector.broadcast %cst_20 : f32 to vector<8x128xf32>
      %c0_21 = arith.constant 0 : index
      %c0_22 = arith.constant 0 : index
      %32 = vector.load %arg7[%c0_21, %c0_22] : memref<8x128xf32, #tpu.memory_space<vmem>>, vector<8x128xf32>
      tpu.vector_store %arg7[%c0_21, %c0_22], %31 {strides = array<i32>} : memref<8x128xf32, #tpu.memory_space<vmem>>, vector<8x128xf32>,
    } else {
    }
    %c0 = arith.constant 0 : index
    %c0_1 = arith.constant 0 : index
    %3 = vector.load %arg1[%c0, %c0_1] : memref<32x22xbf16, #tpu.memory_space<vmem>>, vector<32x22xbf16>
    %c0_2 = arith.constant 0 : index
    %c0_3 = arith.constant 0 : index
    %4 = vector.load %arg3[%c0_2, %c0_3] : memref<22x32xbf16, #tpu.memory_space<vmem>>, vector<22x32xbf16>
    %cst = arith.constant dense<0.000000e+00> : vector<32x32xf32>
    %5 = tpu.matmul %3, %4, %cst {dimension_numbers = #tpu.dot_dimension_numbers<[1], [0], [0], [1], [0, 0, 1, 1], [], []>} : vector<32x22xbf16>, vector<22x32xbf16>, vector<32x32xf32> -> vector<32x32xf32>
    %c0_4 = arith.constant 0 : index
    %c0_5 = arith.constant 0 : index
    %6 = vector.load %arg4[%c0_4, %c0_5] : memref<1x32xf32, #tpu.memory_space<vmem>>, vector<1x32xf32>
    %7 = vector.broadcast %6 : vector<1x32xf32> to vector<32x32xf32>
    %8 = arith.addf %5, %7 : vector<32x32xf32>
    %cst_6 = arith.constant 0.000000e+00 : f32
    %9 = vector.broadcast %cst_6 : f32 to vector<32x32xf32>
    %10 = arith.maximumf %8, %9 : vector<32x32xf32>
    %11 = arith.truncf %10 : vector<32x32xf32> to vector<32x32xbf16>
    %c0_7 = arith.constant 0 : index
    %c0_8 = arith.constant 0 : index
    %12 = vector.load %arg5[%c0_7, %c0_8] : memref<32x128xbf16, #tpu.memory_space<vmem>>, vector<32x128xbf16>
    %cst_9 = arith.constant dense<0.000000e+00> : vector<32x128xf32>
    %13 = tpu.matmul %11, %12, %cst_9 {dimension_numbers = #tpu.dot_dimension_numbers<[1], [0], [0], [1], [0, 0, 1, 1], [], []>} : vector<32x32xbf16>, vector<32x128xbf16>, vector<32x128xf32> -> vector<32x128xf32>
    %c0_10 = arith.constant 0 : index
    %c0_11 = arith.constant 0 : index
    %14 = vector.load %arg6[%c0_10, %c0_11] : memref<1x128xf32, #tpu.memory_space<vmem>>, vector<1x128xf32>
    %15 = vector.broadcast %14 : vector<1x128xf32> to vector<32x128xf32>
    %16 = arith.addf %13, %15 : vector<32x128xf32>
    %cst_12 = arith.constant 0.000000e+00 : f32
    %17 = vector.broadcast %cst_12 : f32 to vector<32x128xf32>
    %18 = arith.maximumf %16, %17 : vector<32x128xf32>
    %19 = tpu.iota {dimensions = array<i32: 0>} : vector<8x32xi32>
    %c0_13 = arith.constant 0 : index
    %c0_14 = arith.constant 0 : index
    %20 = vector.load %arg2[%c0_13, %c0_14] : memref<1x32xi32, #tpu.memory_space<vmem>>, vector<1x32xi32>
    %21 = vector.broadcast %20 : vector<1x32xi32> to vector<8x32xi32>
    %22 = arith.cmpi eq, %21, %19 : vector<8x32xi32>
    %23 = arith.extui %22 : vector<8x32xi1> to vector<8x32xi32>
    %24 = arith.sitofp %23 : vector<8x32xi32> to vector<8x32xf32>
    %25 = arith.truncf %24 : vector<8x32xf32> to vector<8x32xbf16>
    %c0_15 = arith.constant 0 : index
    %c0_16 = arith.constant 0 : index
    %26 = vector.load %arg7[%c0_15, %c0_16] : memref<8x128xf32, #tpu.memory_space<vmem>>, vector<8x128xf32>
    %27 = arith.truncf %18 : vector<32x128xf32> to vector<32x128xbf16>
    %cst_17 = arith.constant dense<0.000000e+00> : vector<8x128xf32>
    %28 = tpu.matmul %25, %27, %cst_17 {dimension_numbers = #tpu.dot_dimension_numbers<[1], [0], [0], [1], [0, 0, 1, 1], [], []>} : vector<8x32xbf16>, vector<32x128xbf16>, vector<8x128xf32> -> vector<8x128xf32>
    %29 = arith.addf %26, %28 : vector<8x128xf32>
    %c0_18 = arith.constant 0 : index
    %c0_19 = arith.constant 0 : index
    %30 = vector.load %arg7[%c0_18, %c0_19] : memref<8x128xf32, #tpu.memory_space<vmem>>, vector<8x128xf32>
    tpu.vector_store %arg7[%c0_18, %c0_19], %29 {strides = array<i32>} : memref<8x128xf32, #tpu.memory_space<vmem>>, vector<8x128xf32>,
    return
  }
  func.func @transform_0(%arg0: i32) -> (i32, i32) {
    %c0_i32 = arith.constant 0 : i32
    %c0_i32_0 = arith.constant 0 : i32
    return %arg0, %c0_i32 : i32, i32
  }
  func.func @transform_1(%arg0: i32) -> (i32, i32) {
    %c0_i32 = arith.constant 0 : i32
    %c0_i32_0 = arith.constant 0 : i32
    return %c0_i32, %arg0 : i32, i32
  }
  func.func @transform_2(%arg0: i32) -> (i32, i32) {
    %c0_i32 = arith.constant 0 : i32
    %c0_i32_0 = arith.constant 0 : i32
    %c0_i32_1 = arith.constant 0 : i32
    return %c0_i32, %c0_i32_0 : i32, i32
  }
  func.func @transform_3(%arg0: i32) -> (i32, i32) {
    %c0_i32 = arith.constant 0 : i32
    %c0_i32_0 = arith.constant 0 : i32
    %c0_i32_1 = arith.constant 0 : i32
    return %c0_i32, %c0_i32_0 : i32, i32
  }
  func.func @transform_4(%arg0: i32) -> (i32, i32) {
    %c0_i32 = arith.constant 0 : i32
    %c0_i32_0 = arith.constant 0 : i32
    %c0_i32_1 = arith.constant 0 : i32
    return %c0_i32, %c0_i32_0 : i32, i32
  }
  func.func @transform_5(%arg0: i32) -> (i32, i32) {
    %c0_i32 = arith.constant 0 : i32
    %c0_i32_0 = arith.constant 0 : i32
    %c0_i32_1 = arith.constant 0 : i32
    return %c0_i32, %c0_i32_0 : i32, i32
  }
  func.func @transform_6(%arg0: i32) -> (i32, i32) {
    %c0_i32 = arith.constant 0 : i32
    %c0_i32_0 = arith.constant 0 : i32
    %c0_i32_1 = arith.constant 0 : i32
    return %c0_i32, %c0_i32_0 : i32, i32
  }
}

</mosaic_0001>

<bundles_post_ra>
// kernel: tpu_custom_call.1
= control target key start
LH: loop header
LB: loop body
LE: loop exit
PB: predicated region body
PF: predicated region fallthrough
CT: control target
= control target key end

     0   :  { %vm70_vm0 = vcmask 1042432   ;;  %vm63_vm1 = vcmask 179200   ;;  %s438_s0 = inlined_call_operand.vmem [shape: bf16[32,22], index: 0, kind: input, shape index: {}]   ;;  %s439_s1 = inlined_call_operand.vmem [shape: s32[1,32], index: 1, kind: input, shape index: {}]   ;;  %s440_s2 = inlined_call_operand.vmem [shape: bf16[22,32], index: 2, kind: input, shape index: {}]   ;;  %s441_s3 = inlined_call_operand.vmem [shape: f32[1,32], index: 3, kind: input, shape index: {}]   ;;  %s442_s4 = inlined_call_operand.vmem [shape: bf16[32,128], index: 4, kind: input, shape index: {}]   ;;  %s443_s5 = inlined_call_operand.vmem [shape: f32[1,128], index: 5, kind: input, shape index: {}]   ;;  %s444_s6 = inlined_call_operand.hbm [shape: f32[8,128], index: 6, kind: output, shape index: {}]  }
   0x1   :  { %v339_v0 = vld [vmem:[%s440_s2 + $0x8] ss:$0 sps:$4 sm:$0x77]   ;;  %v340_v1 = vld [vmem:[%s440_s2] sm:$0xff]  }
   0x2   :  { %335 = vmatprep.subr.msk.bf16.mxu0 %vm70_vm0, %v339_v0  ;;  %v72_v2 = vsel %vm70_vm0, %v339_v0, 0  ;;  %v341_v3 = vld [vmem:[%s438_s0] sm:$0xff]  }
   0x3   :  { %312 = vmatpush3.bf16.msra.mxu0 %v72_v2  ;;  %315 = vmatprep.mubr.msk.bf16.mxu0 %vm63_vm1, %v341_v3 }
   0x4   :  { %313 = vmatprep.subr.bf16.mxu0 %v340_v1 }
   0x5   :  { %11 = vsyncpa [#allocation3], 0  ;;  %v342_v4 = vld [vmem:[%s438_s0 + $0x8] sm:$0xff]   ;;  %v344_v6 = vld [vmem:[%s442_s4] sm:$0xff]   ;;  %vm152_vm2 = vcmask 261120   ;;  %v367_v22 = vmov 0.0   ;;  %v212_v25 = vlaneseq }
   0x6   :  { %v343_v5 = vld [vmem:[%s442_s4 + $0x8] sm:$0xff]   ;;  %v285_v9 = vld [vmem:[%s441_s3] ss:$0 sm:$0xff]  ;;  %vm368_vm3 = vmmov 0  }
   0x7   :  { %314 = vmatpush3.bf16.msra.mxu0 %v340_v1  ;;  %319 = vmatprep.subr.bf16.mxu1 %v343_v5  ;;  %v292_v24 = vld [vmem:[%s443_s5] ss:$0 sm:$0xff]  ;;  %v213_v29 = vshrl.u32 %v212_v25, 7  ;;  %s369_s5 = smov [#allocation2]  }
   0x8   :  { %320 = vmatpush3.bf16.msra.mxu1 %v343_v5  ;;  %327 = vmatprep.subr.bf16.mxu0 %v367_v22  ;;  %v297_v31 = vld [vmem:[%s439_s1] ss:$0 sm:$0xff]  ;;  %s277_s11 = sshll.u32 %s369_s5, 4  ;;  %s278_s11 = int_to_ptr.vmem [resolvable:$true] %s277_s11 }
   0x9   :  { %321 = vmatprep.subr.bf16.mxu1 %v344_v6  ;;  %vm219_vm4 = vcmp.eq.s32.totalorder %v297_v31, %v213_v29  ;;  %s345_s1 = scalar_lea.vmem %s278_s11, 128  ;;  %p350_p1 = scmp.lt.s32.totalorder %s278_s11, %s278_s11 }
   0xa   :  { %316 = vmatmul.mubr.msk.bf16.vlgmr.msra.gmra.mxu0 %vm63_vm1, %v342_v4  ;;  %v298_v40 = vsel %vm219_vm4, 1.0, %v367_v22  ;;  %p346_p0 = scmp.ne.s32.totalorder %s278_s11, %s345_s1  ;;  %p351_p2 = scmp.lt.s32.totalorder %s345_s1, %s345_s1 }
   0xb   :  { %331 = vmatprep.mubr.msk.bf16.mxu0 %vm368_vm3, %v367_v22  ;;  %v222_v42 = vpack.c.bf16 %v298_v40, %v298_v40 }
   0xc   :  { %322 = vmatpush3.bf16.msra.mxu1 %v344_v6  ;;  %p352_p3 = por %p351_p2, %p350_p1 }
   0xe   :  { %p353_p4 = pnand %p352_p3, %p346_p0 }
  0xca   :  { %v317_v7 = vpop.f32.mrf.mxu0 }
  0xcb   :  { %v117_v13 = vadd.f32 %v317_v7, %v285_v9 }
  0xcc   :  { %v108_v8 = vpop.f32.mrf.mxu0 }
  0xcd   :  { %v109_v11 = vadd.f32 %v285_v9, %v108_v8  ;;  %v125_v19 = vmax.f32 %v117_v13, 0.0 }
  0xce   :  { %v318_v10 = vpop.f32.mrf.mxu0 }
  0xcf   :  { %v120_v12 = vadd.f32 %v318_v10, %v285_v9  ;;  %v123_v17 = vmax.f32 %v109_v11, 0.0 }
  0xd0   :  { %v111_v14 = vpop.f32.mrf.mxu0 }
  0xd1   :  { %v112_v15 = vadd.f32 %v285_v9, %v111_v14  ;;  %v126_v16 = vmax.f32 %v120_v12, 0.0 }
  0xd3   :  { %v124_v18 = vmax.f32 %v112_v15, 0.0  ;;  %v128_v21 = vpack.c.bf16 %v126_v16, %v125_v19 }
  0xd5   :  { %v127_v20 = vpack.c.bf16 %v124_v18, %v123_v17 }
  0xd7   :  { %323 = vmatprep.mubr.msk.bf16.mxu1 %vm152_vm2, %v127_v20 }
  0xd8   :  { %324 = vmatmul.mubr.msk.bf16.vlgmr.msra.gmra.mxu1 %vm152_vm2, %v128_v21 }
 0x198   :  { %v325_v23 = vpop.f32.mrf.mxu1 }
 0x199   :  { %v202_v27 = vadd.f32 %v325_v23, %v292_v24 }
 0x19a   :  { %v193_v26 = vpop.f32.mrf.mxu1 }
 0x19b   :  { %v210_v33 = vmax.f32 %v202_v27, 0.0  ;;  %v194_v34 = vadd.f32 %v292_v24, %v193_v26 }
 0x19c   :  { %v326_v28 = vpop.f32.mrf.mxu1 }
 0x19d   :  { %v205_v30 = vadd.f32 %v326_v28, %v292_v24  ;;  %v208_v39 = vmax.f32 %v194_v34, 0.0 }
 0x19e   :  { %v196_v32 = vpop.f32.mrf.mxu1 }
 0x19f   :  { %v211_v35 = vmax.f32 %v205_v30, 0.0  ;;  %v197_v36 = vadd.f32 %v292_v24, %v196_v32 }
 0x1a1   :  { %v225_v37 = vpack.c.bf16 %v211_v35, %v210_v33  ;;  %v209_v38 = vmax.f32 %v197_v36, 0.0 }
 0x1a3   :  { %328 = vmatpush3.bf16.msra.mxu0 %v225_v37  ;;  %v224_v41 = vpack.c.bf16 %v209_v38, %v208_v39 }
 0x1a4   :  { %329 = vmatprep.subr.bf16.mxu0 %v367_v22 }
 0x1a7   :  { %330 = vmatpush3.bf16.msra.mxu0 %v224_v41 }
 0x1aa   :  { %332 = vmatmul.mubr.msk.bf16.vlgmr.msra.gmra.mxu0 %vm152_vm2, %v222_v42 }
 0x26a   :  { %v263_v43 = vpop.f32.mrf.mxu0 }
 0x26b   :  { %270 = vst [vmem:[#allocation2] sm:$0xff] %v263_v43 }
 0x26c   :  { %v333_v44 = vpop.f32.mrf.mxu0 }
 0x26e   :  { %v266_v45 = vpop.f32.mrf.mxu0 }
 0x26f   :  { %356 = shalt.err (!%p353_p4)
}
 0x270   :  { %280 = dma.vmem_to_hbm [thread:$0]  %s278_s11, 128, %s444_s6, [#allocation3]   ;;  %v334_v46 = vpop.f32.mrf.mxu0 }
 0x271   :  { %365 = dma.done.wait [#allocation3], 128  }
 0x272   :  { %366 = vsyncadd [#allocation3], 4294967168 }
 0x273   :  { %284 = vsyncpa [#allocation3], 1 }

</bundles_post_ra>
